<compile_context>
chip_gen: v6e
topology: v6e:2x2x1
jax: 0.10.0
libtpu: 0.0.40
codegen_flags: <defaults>
</compile_context>

<pallas_src>
import functools

import jax
import jax.numpy as jnp
from jax.experimental import pallas as pl
from jax.experimental.pallas import tpu as pltpu


def _round_up(x, m):
    return (x + m - 1) // m * m


def _generator_kernel(xT_ref,
                      w1_ref, b1_ref,
                      w2_ref, b2_ref,
                      w3_ref, b3_ref,
                      w4_ref, b4_ref,
                      outT_ref):
    # Activations are feature-major [features, tile]: batch on the lane axis.
    xT = xT_ref[...]                                  # [2, tile]
    w1 = w1_ref[...]                                  # [dim, 2]

    # Layer 1: Linear(2, dim) + ReLU.  K=2 -> two broadcast multiply-adds on the VPU
    # (skips a degenerate MXU pass and its result-FIFO latency on the critical chain).
    h = w1[:, 0:1] * xT[0:1, :] + w1[:, 1:2] * xT[1:2, :] + b1_ref[...]
    h = jnp.maximum(h, 0.0)                           # [dim, tile]

    # Layer 2: Linear(dim, dim) + ReLU   (MXU, f32 accumulate)
    h = jnp.dot(w2_ref[...], h, preferred_element_type=jnp.float32) + b2_ref[...]
    h = jnp.maximum(h, 0.0)

    # Layer 3: Linear(dim, dim) + ReLU
    h = jnp.dot(w3_ref[...], h, preferred_element_type=jnp.float32) + b3_ref[...]
    h = jnp.maximum(h, 0.0)

    # Layer 4: Linear(dim, 2)  -- output stays transposed [2, tile]: lane-dense store.
    y = jnp.dot(w4_ref[...], h, preferred_element_type=jnp.float32) + b4_ref[...]
    outT_ref[...] = y.astype(outT_ref.dtype)


@functools.partial(jax.jit, static_argnames=("block_m",))
def generator_forward(x, params, *, block_m=512):
    """4-layer MLP forward in a single gridded Pallas kernel.

    x:      [batch, 2] float32 noise (same contract as torch.randn([batch, 2]))
    params: PyTorch-layout weights  w_i: [out_features, in_features],
            biases b_i: [out_features, 1]
    Returns [batch, 2] float32.
    """
    batch = x.shape[0]
    dim = params["w1"].shape[0]

    # Batch tile must be a multiple of 128 so the lane axis is fully dense.
    tile = block_m if batch >= block_m else _round_up(batch, 128)
    padded = _round_up(batch, tile)
    grid = (padded // tile,)

    # Feature-major padded input [2, padded]; pad rows produce junk outputs, sliced off.
    xT = jnp.zeros((2, padded), jnp.float32).at[:, :batch].set(x.T)

    def resident(shape):
        # Whole-array block, constant block index across the grid -> stays in VMEM,
        # no re-DMA between grid steps.
        return pl.BlockSpec(shape, lambda i, _n=len(shape): (0,) * _n)

    in_specs = [
        pl.BlockSpec((2, tile), lambda i: (0, i)),      # xT   (streamed, double-buffered)
        resident((dim, 2)), resident((dim, 1)),         # w1, b1
        resident((dim, dim)), resident((dim, 1)),       # w2, b2
        resident((dim, dim)), resident((dim, 1)),       # w3, b3
        resident((2, dim)), resident((2, 1)),           # w4, b4
    ]
    out_spec = pl.BlockSpec((2, tile), lambda i: (0, i))

    outT = pl.pallas_call(
        _generator_kernel,
        grid=grid,
        in_specs=in_specs,
        out_specs=out_spec,
        out_shape=jax.ShapeDtypeStruct((2, padded), jnp.float32),
        compiler_params=pltpu.CompilerParams(
            dimension_semantics=("parallel",),          # shard batch tiles across TCs (v7x)
            vmem_limit_bytes=32 * 1024 * 1024,          # tiny working set; explicit + safe
        ),
    )(xT,
      params["w1"], params["b1"],
      params["w2"], params["b2"],
      params["w3"], params["b3"],
      params["w4"], params["b4"])

    return outT[:, :batch].T


def init_generator_params(key, dim):
    """PyTorch nn.Linear default init: U(-1/sqrt(fan_in), +1/sqrt(fan_in)).

    Weights stored in PyTorch layout [out_features, in_features];
    biases stored as [out_features, 1] (feature-major broadcast inside the kernel).
    """
    def linear(key, fan_in, fan_out):
        kw, kb = jax.random.split(key)
        bound = 1.0 / float(fan_in) ** 0.5
        w = jax.random.uniform(kw, (fan_out, fan_in), jnp.float32, -bound, bound)
        b = jax.random.uniform(kb, (fan_out, 1), jnp.float32, -bound, bound)
        return w, b

    k1, k2, k3, k4 = jax.random.split(key, 4)
    w1, b1 = linear(k1, 2, dim)
    w2, b2 = linear(k2, dim, dim)
    w3, b3 = linear(k3, dim, dim)
    w4, b4 = linear(k4, dim, 2)
    return {"w1": w1, "b1": b1, "w2": w2, "b2": b2,
            "w3": w3, "b3": b3, "w4": w4, "b4": b4}


def _reference_forward(x, p):
    # Pure-JAX reference with PyTorch semantics: y = x @ W.T + b
    h = jnp.maximum(x @ p["w1"].T + p["b1"].T, 0.0)
    h = jnp.maximum(h @ p["w2"].T + p["b2"].T, 0.0)
    h = jnp.maximum(h @ p["w3"].T + p["b3"].T, 0.0)
    return h @ p["w4"].T + p["b4"].T


if __name__ == "__main__":
    # Larger M: batching many noise samples amortizes launch/prologue overhead and
    # fills MXU/VPU lanes; 2048 rows -> 4 grid tiles of 512 (still tiny data: ~16 KiB in).
    batch_size = 2048
    dim = 32                      # args.dim

    key = jax.random.PRNGKey(0)
    k_params, k_noise = jax.random.split(key)

    params = init_generator_params(k_params, dim)
    # forward() draws fresh Gaussian noise; drawn deterministically here from PRNGKey(0).
    # TODO(synk): could generate the noise in-kernel via pltpu.prng_seed + stateful_normal
    # to drop the x HBM stream entirely; kept external for deterministic reference checks.
    x = jax.random.normal(k_noise, (batch_size, 2), dtype=jnp.float32)

    out = jax.block_until_ready(generator_forward(x, params))
    ref = _reference_forward(x, params)

    assert out.shape == (batch_size, 2), out.shape
    max_err = float(jnp.max(jnp.abs(out - ref)))
    assert jnp.allclose(out, ref, atol=1e-4, rtol=1e-4), f"mismatch vs reference, max_err={max_err}"

    # Also check a small, non-tile-aligned batch path (padding branch).
    out_small = jax.block_until_ready(generator_forward(x[:8], params))
    assert out_small.shape == (8, 2)
    assert jnp.allclose(out_small, ref[:8], atol=1e-4, rtol=1e-4), "small-batch mismatch"

    print("KERNEL_OK")
</pallas_src>

<mosaic_0001>
module attributes {stable_mosaic.version = 11 : i64} {
  func.func @_generator_kernel(%arg0: i32, %arg1: memref<2x512xf32, #tpu.memory_space<vmem>>, %arg2: memref<32x2xf32, #tpu.memory_space<vmem>>, %arg3: memref<32x1xf32, #tpu.memory_space<vmem>>, %arg4: memref<32x32xf32, #tpu.memory_space<vmem>>, %arg5: memref<32x1xf32, #tpu.memory_space<vmem>>, %arg6: memref<32x32xf32, #tpu.memory_space<vmem>>, %arg7: memref<32x1xf32, #tpu.memory_space<vmem>>, %arg8: memref<2x32xf32, #tpu.memory_space<vmem>>, %arg9: memref<2x1xf32, #tpu.memory_space<vmem>>, %arg10: memref<2x512xf32, #tpu.memory_space<vmem>>) attributes {dimension_semantics = [#tpu.dimension_semantics<parallel>], iteration_bounds = array<i64: 4>, scalar_prefetch = 0 : i64, scratch_operands = 0 : i64, tpu.core_type = #tpu.core_type<tc>, window_params = [{transform_indices = @transform_0, window_bounds = array<i64: 2, 512>}, {pipeline_mode = #tpu.pipeline_mode<synchronous>, transform_indices = @transform_1, window_bounds = array<i64: 32, 2>}, {pipeline_mode = #tpu.pipeline_mode<synchronous>, transform_indices = @transform_2, window_bounds = array<i64: 32, 1>}, {pipeline_mode = #tpu.pipeline_mode<synchronous>, transform_indices = @transform_3, window_bounds = array<i64: 32, 32>}, {pipeline_mode = #tpu.pipeline_mode<synchronous>, transform_indices = @transform_4, window_bounds = array<i64: 32, 1>}, {pipeline_mode = #tpu.pipeline_mode<synchronous>, transform_indices = @transform_5, window_bounds = array<i64: 32, 32>}, {pipeline_mode = #tpu.pipeline_mode<synchronous>, transform_indices = @transform_6, window_bounds = array<i64: 32, 1>}, {pipeline_mode = #tpu.pipeline_mode<synchronous>, transform_indices = @transform_7, window_bounds = array<i64: 2, 32>}, {pipeline_mode = #tpu.pipeline_mode<synchronous>, transform_indices = @transform_8, window_bounds = array<i64: 2, 1>}, {transform_indices = @transform_9, window_bounds = array<i64: 2, 512>}]} {
    %c0 = arith.constant 0 : index
    %c0_0 = arith.constant 0 : index
    %0 = vector.load %arg1[%c0, %c0_0] : memref<2x512xf32, #tpu.memory_space<vmem>>, vector<2x512xf32>
    %c0_1 = arith.constant 0 : index
    %c0_2 = arith.constant 0 : index
    %1 = vector.load %arg2[%c0_1, %c0_2] : memref<32x2xf32, #tpu.memory_space<vmem>>, vector<32x2xf32>
    %2 = vector.extract_strided_slice %1 {offsets = [0, 0], sizes = [32, 1], strides = [1, 1]} : vector<32x2xf32> to vector<32x1xf32>
    %3 = vector.extract_strided_slice %0 {offsets = [0, 0], sizes = [1, 512], strides = [1, 1]} : vector<2x512xf32> to vector<1x512xf32>
    %4 = vector.broadcast %2 : vector<32x1xf32> to vector<32x512xf32>
    %5 = vector.broadcast %3 : vector<1x512xf32> to vector<32x512xf32>
    %6 = arith.mulf %4, %5 : vector<32x512xf32>
    %7 = vector.extract_strided_slice %1 {offsets = [0, 1], sizes = [32, 1], strides = [1, 1]} : vector<32x2xf32> to vector<32x1xf32>
    %8 = vector.extract_strided_slice %0 {offsets = [1, 0], sizes = [1, 512], strides = [1, 1]} : vector<2x512xf32> to vector<1x512xf32>
    %9 = vector.broadcast %7 : vector<32x1xf32> to vector<32x512xf32>
    %10 = vector.broadcast %8 : vector<1x512xf32> to vector<32x512xf32>
    %11 = arith.mulf %9, %10 : vector<32x512xf32>
    %12 = arith.addf %6, %11 : vector<32x512xf32>
    %c0_3 = arith.constant 0 : index
    %c0_4 = arith.constant 0 : index
    %13 = vector.load %arg3[%c0_3, %c0_4] : memref<32x1xf32, #tpu.memory_space<vmem>>, vector<32x1xf32>
    %14 = vector.broadcast %13 : vector<32x1xf32> to vector<32x512xf32>
    %15 = arith.addf %12, %14 : vector<32x512xf32>
    %cst = arith.constant 0.000000e+00 : f32
    %16 = vector.broadcast %cst : f32 to vector<32x512xf32>
    %17 = arith.maximumf %15, %16 : vector<32x512xf32>
    %c0_5 = arith.constant 0 : index
    %c0_6 = arith.constant 0 : index
    %18 = vector.load %arg4[%c0_5, %c0_6] : memref<32x32xf32, #tpu.memory_space<vmem>>, vector<32x32xf32>
    %cst_7 = arith.constant dense<0.000000e+00> : vector<32x512xf32>
    %19 = tpu.matmul %18, %17, %cst_7 {dimension_numbers = #tpu.dot_dimension_numbers<[1], [0], [0], [1], [0, 0, 1, 1], [], []>} : vector<32x32xf32>, vector<32x512xf32>, vector<32x512xf32> -> vector<32x512xf32>
    %c0_8 = arith.constant 0 : index
    %c0_9 = arith.constant 0 : index
    %20 = vector.load %arg5[%c0_8, %c0_9] : memref<32x1xf32, #tpu.memory_space<vmem>>, vector<32x1xf32>
    %21 = vector.broadcast %20 : vector<32x1xf32> to vector<32x512xf32>
    %22 = arith.addf %19, %21 : vector<32x512xf32>
    %cst_10 = arith.constant 0.000000e+00 : f32
    %23 = vector.broadcast %cst_10 : f32 to vector<32x512xf32>
    %24 = arith.maximumf %22, %23 : vector<32x512xf32>
    %c0_11 = arith.constant 0 : index
    %c0_12 = arith.constant 0 : index
    %25 = vector.load %arg6[%c0_11, %c0_12] : memref<32x32xf32, #tpu.memory_space<vmem>>, vector<32x32xf32>
    %cst_13 = arith.constant dense<0.000000e+00> : vector<32x512xf32>
    %26 = tpu.matmul %25, %24, %cst_13 {dimension_numbers = #tpu.dot_dimension_numbers<[1], [0], [0], [1], [0, 0, 1, 1], [], []>} : vector<32x32xf32>, vector<32x512xf32>, vector<32x512xf32> -> vector<32x512xf32>
    %c0_14 = arith.constant 0 : index
    %c0_15 = arith.constant 0 : index
    %27 = vector.load %arg7[%c0_14, %c0_15] : memref<32x1xf32, #tpu.memory_space<vmem>>, vector<32x1xf32>
    %28 = vector.broadcast %27 : vector<32x1xf32> to vector<32x512xf32>
    %29 = arith.addf %26, %28 : vector<32x512xf32>
    %cst_16 = arith.constant 0.000000e+00 : f32
    %30 = vector.broadcast %cst_16 : f32 to vector<32x512xf32>
    %31 = arith.maximumf %29, %30 : vector<32x512xf32>
    %c0_17 = arith.constant 0 : index
    %c0_18 = arith.constant 0 : index
    %32 = vector.load %arg8[%c0_17, %c0_18] : memref<2x32xf32, #tpu.memory_space<vmem>>, vector<2x32xf32>
    %cst_19 = arith.constant dense<0.000000e+00> : vector<2x512xf32>
    %33 = tpu.matmul %32, %31, %cst_19 {dimension_numbers = #tpu.dot_dimension_numbers<[1], [0], [0], [1], [0, 0, 1, 1], [], []>} : vector<2x32xf32>, vector<32x512xf32>, vector<2x512xf32> -> vector<2x512xf32>
    %c0_20 = arith.constant 0 : index
    %c0_21 = arith.constant 0 : index
    %34 = vector.load %arg9[%c0_20, %c0_21] : memref<2x1xf32, #tpu.memory_space<vmem>>, vector<2x1xf32>
    %35 = vector.broadcast %34 : vector<2x1xf32> to vector<2x512xf32>
    %36 = arith.addf %33, %35 : vector<2x512xf32>
    %c0_22 = arith.constant 0 : index
    %c0_23 = arith.constant 0 : index
    %37 = vector.load %arg10[%c0_22, %c0_23] : memref<2x512xf32, #tpu.memory_space<vmem>>, vector<2x512xf32>
    tpu.vector_store %arg10[%c0_22, %c0_23], %36 {strides = array<i32>} : memref<2x512xf32, #tpu.memory_space<vmem>>, vector<2x512xf32>,
    return
  }
  func.func @transform_0(%arg0: i32) -> (i32, i32) {
    %c0_i32 = arith.constant 0 : i32
    %c0_i32_0 = arith.constant 0 : i32
    return %c0_i32, %arg0 : i32, i32
  }
  func.func @transform_1(%arg0: i32) -> (i32, i32) {
    %c0_i32 = arith.constant 0 : i32
    %c0_i32_0 = arith.constant 0 : i32
    %c0_i32_1 = arith.constant 0 : i32
    return %c0_i32, %c0_i32_0 : i32, i32
  }
  func.func @transform_2(%arg0: i32) -> (i32, i32) {
    %c0_i32 = arith.constant 0 : i32
    %c0_i32_0 = arith.constant 0 : i32
    %c0_i32_1 = arith.constant 0 : i32
    return %c0_i32, %c0_i32_0 : i32, i32
  }
  func.func @transform_3(%arg0: i32) -> (i32, i32) {
    %c0_i32 = arith.constant 0 : i32
    %c0_i32_0 = arith.constant 0 : i32
    %c0_i32_1 = arith.constant 0 : i32
    return %c0_i32, %c0_i32_0 : i32, i32
  }
  func.func @transform_4(%arg0: i32) -> (i32, i32) {
    %c0_i32 = arith.constant 0 : i32
    %c0_i32_0 = arith.constant 0 : i32
    %c0_i32_1 = arith.constant 0 : i32
    return %c0_i32, %c0_i32_0 : i32, i32
  }
  func.func @transform_5(%arg0: i32) -> (i32, i32) {
    %c0_i32 = arith.constant 0 : i32
    %c0_i32_0 = arith.constant 0 : i32
    %c0_i32_1 = arith.constant 0 : i32
    return %c0_i32, %c0_i32_0 : i32, i32
  }
  func.func @transform_6(%arg0: i32) -> (i32, i32) {
    %c0_i32 = arith.constant 0 : i32
    %c0_i32_0 = arith.constant 0 : i32
    %c0_i32_1 = arith.constant 0 : i32
    return %c0_i32, %c0_i32_0 : i32, i32
  }
  func.func @transform_7(%arg0: i32) -> (i32, i32) {
    %c0_i32 = arith.constant 0 : i32
    %c0_i32_0 = arith.constant 0 : i32
    %c0_i32_1 = arith.constant 0 : i32
    return %c0_i32, %c0_i32_0 : i32, i32
  }
  func.func @transform_8(%arg0: i32) -> (i32, i32) {
    %c0_i32 = arith.constant 0 : i32
    %c0_i32_0 = arith.constant 0 : i32
    %c0_i32_1 = arith.constant 0 : i32
    return %c0_i32, %c0_i32_0 : i32, i32
  }
  func.func @transform_9(%arg0: i32) -> (i32, i32) {
    %c0_i32 = arith.constant 0 : i32
    %c0_i32_0 = arith.constant 0 : i32
    return %c0_i32, %arg0 : i32, i32
  }
}

</mosaic_0001>

<bundles_post_ra>
// kernel: generator_forward.1
= control target key start
LH: loop header
LB: loop body
LE: loop exit
PB: predicated region body
PF: predicated region fallthrough
CT: control target
= control target key end

     0   :  { %14 = vsyncpa [#allocation3], 0  ;;  %s1691_s0 = inlined_call_operand.vmem [shape: f32[2,2048], index: 0, kind: input, shape index: {}]   ;;  %s1692_s1 = inlined_call_operand.vmem [shape: f32[32,2], index: 1, kind: input, shape index: {}]   ;;  %s1693_s2 = inlined_call_operand.vmem [shape: f32[32,1], index: 2, kind: input, shape index: {}]   ;;  %s1694_s3 = inlined_call_operand.vmem [shape: f32[32,32], index: 3, kind: input, shape index: {}]   ;;  %s1695_s4 = inlined_call_operand.vmem [shape: f32[32,1], index: 4, kind: input, shape index: {}]   ;;  %s1696_s5 = inlined_call_operand.vmem [shape: f32[32,32], index: 5, kind: input, shape index: {}]   ;;  %s1697_s6 = inlined_call_operand.vmem [shape: f32[32,1], index: 6, kind: input, shape index: {}]   ;;  %s1698_s7 = inlined_call_operand.vmem [shape: f32[2,32], index: 7, kind: input, shape index: {}]   ;;  %s1699_s8 = inlined_call_operand.vmem [shape: f32[2,1], index: 8, kind: input, shape index: {}]   ;;  %s1700_s9 = inlined_call_operand.hbm [shape: f32[2,2048], index: 9, kind: output, shape index: {}]  }
   0x1   :  { %16 = vsyncpa [#allocation3 + $0x1], 0  ;;  %s1468_s30 = smov 0   ;;  %s1470_s10 = smov 0  }
   0x2   :  { %s1472_s11 = smov 0   ;;  %s1474_s12 = smov 0  }
   0x3 LB: > { %s1489_s13 = sadd.s32 4294967295, %s1411_s12   ;;  %s1270_s14 = sadd.s32 4294967294, %s1411_s12   ;;  %s1411_s12 = sphi %s1474_s12, %s1706_s12   ;;  %s1407_s11 = sphi %s1472_s11, %s1705_s11   ;;  %s1403_s10 = sphi %s1470_s10, %s1704_s10   ;;  %s1399_s30 = sphi %s1468_s30, %s1703_s30  }
   0x4   : > { %s1493_s15 = sadd.s32 1, %s1411_s12   ;;  %s223_s16 = sadd.s32 1, %s1407_s11 }
   0x5   : > { %s220_s17 = ssub.s32 %s1411_s12, %s1493_s15  ;;  %p233_p0 = scmp.ne.s32.totalorder %s1407_s11, %s1403_s10 }
   0x6   : > { %p221_p1 = scmp.eq.s32.totalorder %s220_s17, 0  ;;  %p234_p2 = scmp.eq.s32.totalorder %s1489_s13, 3 }
   0x7   : > { %p239_p3 = scmp.ne.s32.totalorder %s1403_s10, %s1399_s30  ;;  %p240_p4 = scmp.eq.s32.totalorder %s1270_s14, 3 }
   0x8   : > { %s1504_s18 = scalar_select %p221_p1, %s1407_s11, %s223_s16  }
   0x9   : > { %p1506_p5 = por %p234_p2, %p233_p0  ;;  %p1510_p6 = por %p240_p4, %p239_p3 }
   0xa   : > { %p1273_p7 = scmp.ge.s32.totalorder %s1411_s12, 1  ;;  %p291_p8 = scmp.lt.s32.totalorder %s1411_s12, 5 }
   0xc   : > { %p292_p9 = pnand %p1273_p7, %p291_p8 }
   0xd   : > { %s1275_s16 = sshll.u32 (!%p292_p9), %s1489_s13, 2  ;;  %s324_s14 = sand.u32 (!%p292_p9), 1, %s1403_s10  }
   0xe   : > { %295 = sbr.rel (%p292_p9) target bundleno = 833 (0x341), region = 56  ;;  %p328_p10 = scmp.lt.s32.totalorder (!%p292_p9), %s1275_s16, 15 }
   0xf   : > { %s1197_s26 = scalar_lea.sflag (!%p292_p9), [#allocation3], %s324_s14  ;;  %s1417_s28 = smov (!%p292_p9), [#allocation2]  }
  0x10   : > { %s1355_s29 = sshll.u32 (!%p292_p9), %s1417_s28, 4  ;;  %s1356_s29 = int_to_ptr.vmem [resolvable:$false] %s1355_s29 }
  0x13   : > { %v338_v0 = vld [vmem:[%s1692_s1 + $0x18] sm:$0xff]  ;;  %v337_v1 = vld [vmem:[%s1692_s1 + $0x10] sm:$0xff]  ;;  %v1413_v2 = vmov 1   ;;  %v1414_v3 = vmov 0   ;;  %v336_v4 = vld [vmem:[%s1692_s1 + $0x8] sm:$0xff]  ;;  %v1415_v15 = vmov 0.0   ;;  %v360_v20 = vlaneseq }
  0x14   : > { %1344 = vset.pattern.permute.xlu0 %v1413_v2  ;;  %1345 = vset.pattern.permute.xlu1 %v1414_v3  ;;  %v335_v5 = vld [vmem:[%s1692_s1] sm:$0xff]  ;;  %v499_v6 = vld [vmem:[%s1693_s2 + $0x18] sm:$0xff]  ;;  %v497_v7 = vld [vmem:[%s1693_s2 + $0x8] sm:$0xff]  ;;  %s1708_s16 = smov (!%p328_p10, %s1275_s16), 15  ;;  %vm580_vm0 = vcmask 261120  }
  0x15   : > { %425 = vperm.xlu0 %1344, %v338_v0   ;;  %351 = vperm.xlu1 %1345, %v337_v1   ;;  %v559_v8 = vld [vmem:[%s1695_s4 + $0x18] sm:$0xff]  ;;  %v498_v9 = vld [vmem:[%s1693_s2 + $0x10] sm:$0xff]  ;;  %v557_v10 = vld [vmem:[%s1695_s4 + $0x8] sm:$0xff]  ;;  %s1276_s17 = sshll.u32 %s1708_s16, 1  ;;  %v1570_v21 = vshrl.u32 %v360_v20, 7  ;;  %s1274_s16 = sshll.u32 %s324_s14, 3 }
  0x16   : > { %v496_v11 = vld [vmem:[%s1693_s2] sm:$0xff]  ;;  %v794_v12 = vld [vmem:[%s1697_s6 + $0x18] sm:$0xff]  ;;  %v558_v13 = vld [vmem:[%s1695_s4 + $0x10] sm:$0xff]  ;;  %657 = vmatprep.mubr.f32.mxu0 %v1415_v15  ;;  %746 = vmatprep.mubr.f32.mxu1 %v1415_v15  ;;  %s331_s23 = scalar_lea.vmem %s1691_s0, %s1276_s17  ;;  %s1300_s17 = sshll.u32 %s1489_s13, 7 }
  0x17   : > { %v792_v14 = vld [vmem:[%s1697_s6 + $0x8] sm:$0xff]  ;;  %v556_v16 = vld [vmem:[%s1695_s4] sm:$0xff]  ;;  %v793_v18 = vld [vmem:[%s1697_s6 + $0x10] sm:$0xff]  ;;  %v430_v22 = vsub.s32 1, %v1570_v21  ;;  %v438_v23 = vsub.s32 5, %v1570_v21  ;;  %v434_v24 = vsub.s32 3, %v1570_v21  ;;  %s1209_s25 = scalar_lea.hbm %s1700_s9, %s1300_s17 }
  0x18   : > { %v1022_v17 = vld [vmem:[%s1699_s8] sm:$0x3]  ;;  %v442_v25 = vsub.s32 7, %v1570_v21  ;;  %v362_v26 = vsub.s32 0, %v1570_v21  ;;  %v366_v27 = vsub.s32 2, %v1570_v21  ;;  %v370_v28 = vsub.s32 4, %v1570_v21 }
  0x19   : > { %1346 = vset.pattern.permute.xlu1 %v1413_v2  ;;  %417 = vperm.xlu0 %1344, %v336_v4   ;;  %v791_v19 = vld [vmem:[%s1697_s6] sm:$0xff]  ;;  %v374_v29 = vsub.s32 6, %v1570_v21  ;;  %s326_s21 = scalar_lea.vmem [#allocation2], %s1274_s16  ;;  %s1357_s13 = scalar_lea.vmem %s1356_s29, 256 }
  0x1a   : > { %421 = vperm.xlu1 %1346, %v337_v1   ;;  %v334_v31 = vld [vmem:[%s331_s23] sm:$0xff]  ;;  %s1211_s22 = sshll.u32 %s326_s21, 4  ;;  %s1212_s22 = int_to_ptr.vmem [resolvable:$true] %s1211_s22 }
  0x1b   : > { %v431_v33 = vrot.slane %v334_v31, %v430_v22  ;;  %v439_v34 = vrot.slane %v334_v31, %v438_v23  ;;  %v435_v35 = vrot.slane %v334_v31, %v434_v24  ;;  %v443_v36 = vrot.slane %v334_v31, %v442_v25  ;;  %s1351_s27 = scalar_lea.vmem %s1212_s22, 128  ;;  %p1358_p0 = scmp.lt.s32.totalorder %s1212_s22, %s1356_s29 }
  0x1c   : > { %v363_v37 = vrot.slane %v334_v31, %v362_v26  ;;  %v367_v38 = vrot.slane %v334_v31, %v366_v27  ;;  %v371_v39 = vrot.slane %v334_v31, %v370_v28  ;;  %v375_v40 = vrot.slane %v334_v31, %v374_v29  ;;  %p1352_p11 = scmp.ne.s32.totalorder %s1212_s22, %s1351_s27  ;;  %p1359_p1 = scmp.lt.s32.totalorder %s1357_s13, %s1351_s27 }
  0x1d   : > { %1348 = vset.pattern.permute.xlu0 %v1414_v3  ;;  %v451_v43 = vrot.slane %v431_v33, %v430_v22  ;;  %v1585_v44 = vrot.slane %v439_v34, %v430_v22  ;;  %v455_v45 = vrot.slane %v435_v35, %v430_v22  ;;  %v463_v46 = vrot.slane %v443_v36, %v430_v22 }
  0x1e   : > { %1347 = vset.pattern.permute.xlu1 %v1414_v3  ;;  %356 = vperm.xlu0 %1348, %v338_v0   ;;  %v383_v47 = vrot.slane %v363_v37, %v362_v26  ;;  %v387_v48 = vrot.slane %v367_v38, %v362_v26  ;;  %v391_v49 = vrot.slane %v371_v39, %v362_v26  ;;  %p1353_p12 = pnand %p1352_p11, %p1506_p5  ;;  %p1360_p2 = por %p1359_p1, %p1358_p0 }
  0x1f   : > { %346 = vperm.xlu1 %1347, %v336_v4   ;;  %v395_v50 = vrot.slane %v375_v40, %v362_v26 }
  0x20   : > { %p1354_p13 = pneg %p1353_p12 }
  0x22   : > { %341 = vperm.xlu0 %1348, %v335_v5   ;;  %p1361_p3 = pnand %p1360_p2, %p1354_p13 }
  0x23   : > { %517 = vperm.xlu1 %1347, %v499_v6  }
  0x26   : > { %507 = vperm.xlu0 %1348, %v497_v7  }
  0x27   : > { %1349 = vset.pattern.permute.xlu1 %v1413_v2 }
  0x28   : > { %413 = vperm.xlu1 %1349, %v335_v5  }
  0x2a   : > { %577 = vperm.xlu0 %1348, %v559_v8  }
  0x2c   : > { %1350 = vset.pattern.permute.xlu1 %v1414_v3 }
  0x2d   : > { %512 = vperm.xlu1 %1350, %v498_v9  }
  0x2e   : > { %567 = vperm.xlu0 %1348, %v557_v10  }
  0x31   : > { %502 = vperm.xlu1 %1350, %v496_v11  }
  0x32   : > { %812 = vperm.xlu0 %1348, %v794_v12  }
  0x35   : > { %572 = vperm.xlu1 %1350, %v558_v13  }
  0x36   : > { %802 = vperm.xlu0 %1348, %v792_v14  }
  0x39   : > { %562 = vperm.xlu1 %1350, %v556_v16  }
  0x3a   : > { %1025 = vperm.xlu0 %1348, %v1022_v17  }
  0x3d   : > { %807 = vperm.xlu1 %1350, %v793_v18  }
  0x41   : > { %797 = vperm.xlu1 %1350, %v791_v19  }
  0x90   : > { %v1583_v30 = vpop.permute.xlu1 %351  ;;  %v426_v32 = vpop.permute.xlu0 %425 }
  0x91   : > { %v476_v51 = vmul.f32 %v451_v43, %v426_v32  ;;  %v478_v52 = vmul.f32 %v1585_v44, %v426_v32  ;;  %v477_v53 = vmul.f32 %v455_v45, %v426_v32  ;;  %v479_v54 = vmul.f32 %v463_v46, %v426_v32 }
  0x92   : > { %v404_v20 = vmul.f32 %v383_v47, %v1583_v30  ;;  %v405_v22 = vmul.f32 %v387_v48, %v1583_v30  ;;  %v407_v23 = vmul.f32 %v395_v50, %v1583_v30  ;;  %v406_v29 = vmul.f32 %v391_v49, %v1583_v30 }
  0x94   : > { %v418_v41 = vpop.permute.xlu0 %417 }
  0x95   : > { %v422_v42 = vpop.permute.xlu1 %421  ;;  %v468_v2 = vmul.f32 %v451_v43, %v418_v41  ;;  %v469_v3 = vmul.f32 %v455_v45, %v418_v41  ;;  %v471_v4 = vmul.f32 %v463_v46, %v418_v41  ;;  %v470_v24 = vmul.f32 %v1585_v44, %v418_v41 }
  0x96   : > { %v473_v1 = vmul.f32 %v455_v45, %v422_v42  ;;  %v475_v11 = vmul.f32 %v463_v46, %v422_v42  ;;  %v472_v25 = vmul.f32 %v451_v43, %v422_v42  ;;  %v474_v26 = vmul.f32 %v1585_v44, %v422_v42 }
  0x98   : > { %v489_v31 = vadd.f32 %v473_v1, %v405_v22  ;;  %v491_v32 = vadd.f32 %v475_v11, %v407_v23 }
  0x99   : > { %v357_v55 = vpop.permute.xlu0 %356 }
  0x9a   : > { %v408_v56 = vmul.f32 %v383_v47, %v357_v55  ;;  %v410_v57 = vmul.f32 %v391_v49, %v357_v55  ;;  %v347_v58 = vpop.permute.xlu1 %346  ;;  %v409_v59 = vmul.f32 %v387_v48, %v357_v55  ;;  %v411_v60 = vmul.f32 %v395_v50, %v357_v55 }
  0x9b   : > { %v400_v12 = vmul.f32 %v383_v47, %v347_v58  ;;  %v401_v13 = vmul.f32 %v387_v48, %v347_v58  ;;  %v403_v14 = vmul.f32 %v395_v50, %v347_v58  ;;  %v402_v27 = vmul.f32 %v391_v49, %v347_v58 }
  0x9c   : > { %v493_v61 = vadd.f32 %v477_v53, %v409_v59  ;;  %v495_v62 = vadd.f32 %v479_v54, %v411_v60  ;;  %v492_v63 = vadd.f32 %v476_v51, %v408_v56  ;;  %v494_v0 = vadd.f32 %v478_v52, %v410_v57 }
  0x9d   : > { %v342_v6 = vpop.permute.xlu0 %341  ;;  %v485_v33 = vadd.f32 %v469_v3, %v401_v13  ;;  %v487_v37 = vadd.f32 %v471_v4, %v403_v14  ;;  %v484_v38 = vadd.f32 %v468_v2, %v400_v12  ;;  %v488_v52 = vadd.f32 %v472_v25, %v404_v20  ;;  %v552_v13 = vld [vmem:[%s1694_s3] sm:$0xff]  ;;  %v553_v14 = vld [vmem:[%s1694_s3 + $0x8] sm:$0xff] }
  0x9e   : > { %v518_v5 = vpop.permute.xlu1 %517  ;;  %v396_v34 = vmul.f32 %v383_v47, %v342_v6  ;;  %v397_v35 = vmul.f32 %v387_v48, %v342_v6  ;;  %v399_v39 = vmul.f32 %v395_v50, %v342_v6  ;;  %v398_v51 = vmul.f32 %v391_v49, %v342_v6 }
  0x9f   : > { %v533_v7 = vadd.f32 %v518_v5, %v493_v61  ;;  %v535_v8 = vadd.f32 %v518_v5, %v495_v62  ;;  %v532_v9 = vadd.f32 %v518_v5, %v492_v63  ;;  %v534_v10 = vadd.f32 %v518_v5, %v494_v0 }
  0xa0   : > { %v490_v53 = vadd.f32 %v474_v26, %v406_v29  ;;  %v486_v54 = vadd.f32 %v470_v24, %v402_v27 }
  0xa1   : > { %v549_v16 = vmax.f32 %v533_v7, 0.0  ;;  %v551_v17 = vmax.f32 %v535_v8, 0.0  ;;  %v548_v18 = vmax.f32 %v532_v9, 0.0  ;;  %v550_v19 = vmax.f32 %v534_v10, 0.0  ;;  %v508_v36 = vpop.permute.xlu0 %507 }
  0xa2   : > { %v525_v56 = vadd.f32 %v508_v36, %v485_v33  ;;  %v527_v57 = vadd.f32 %v508_v36, %v487_v37  ;;  %v524_v58 = vadd.f32 %v508_v36, %v484_v38  ;;  %v526_v61 = vadd.f32 %v508_v36, %v486_v54 }
  0xa3   : > { %v414_v28 = vpop.permute.xlu1 %413  ;;  %617 = vmatprep.subr.mxu0 %v549_v16  ;;  %706 = vmatprep.subr.mxu1 %v551_v17  ;;  %v554_v16 = vld [vmem:[%s1694_s3 + $0x10] sm:$0xff]  ;;  %v555_v17 = vld [vmem:[%s1694_s3 + $0x18] sm:$0xff] }
  0xa4   : > { %618 = vmatpush1.msra.mxu0 %v548_v18  ;;  %707 = vmatpush1.msra.mxu1 %v550_v19  ;;  %v464_v40 = vmul.f32 %v451_v43, %v414_v28  ;;  %v465_v41 = vmul.f32 %v455_v45, %v414_v28  ;;  %v467_v42 = vmul.f32 %v463_v46, %v414_v28  ;;  %v541_v1 = vmax.f32 %v525_v56, 0.0 }
  0xa5   : > { %v466_v30 = vmul.f32 %v1585_v44, %v414_v28  ;;  %v543_v44 = vmax.f32 %v527_v57, 0.0  ;;  %v540_v6 = vmax.f32 %v524_v58, 0.0  ;;  %v542_v7 = vmax.f32 %v526_v61, 0.0  ;;  %v578_v29 = vpop.permute.xlu0 %577 }
  0xa6   : > { %v481_v62 = vadd.f32 %v465_v41, %v397_v35  ;;  %v483_v50 = vadd.f32 %v467_v42, %v399_v39  ;;  %v480_v43 = vadd.f32 %v464_v40, %v396_v34 }
  0xa7   : > { %v482_v2 = vadd.f32 %v466_v30, %v398_v51 }
  0xa8   : > { %v513_v55 = vpop.permute.xlu1 %512 }
  0xa9   : > { %v529_v47 = vadd.f32 %v513_v55, %v489_v31  ;;  %v531_v48 = vadd.f32 %v513_v55, %v491_v32  ;;  %v528_v59 = vadd.f32 %v513_v55, %v488_v52  ;;  %v530_v60 = vadd.f32 %v513_v55, %v490_v53  ;;  %v568_v52 = vpop.permute.xlu0 %567 }
  0xab   : > { %v545_v45 = vmax.f32 %v529_v47, 0.0  ;;  %v547_v46 = vmax.f32 %v531_v48, 0.0  ;;  %v544_v49 = vmax.f32 %v528_v59, 0.0  ;;  %v546_v63 = vmax.f32 %v530_v60, 0.0 }
  0xac   : > { %v503_v0 = vpop.permute.xlu1 %502 }
  0xad   : > { %619 = vmatprep.subr.mxu0 %v545_v45  ;;  %708 = vmatprep.subr.mxu1 %v547_v46  ;;  %v521_v3 = vadd.f32 %v503_v0, %v481_v62  ;;  %v523_v4 = vadd.f32 %v503_v0, %v483_v50  ;;  %v520_v5 = vadd.f32 %v503_v0, %v480_v43 }
  0xae   : > { %620 = vmatpush1.msra.mxu0 %v544_v49  ;;  %709 = vmatpush1.msra.mxu1 %v546_v63  ;;  %v522_v8 = vadd.f32 %v503_v0, %v482_v2 }
  0xaf   : > { %621 = vmatprep.subr.mxu0 %v541_v1  ;;  %710 = vmatprep.subr.mxu1 %v543_v44  ;;  %v537_v9 = vmax.f32 %v521_v3, 0.0  ;;  %v539_v10 = vmax.f32 %v523_v4, 0.0  ;;  %v536_v11 = vmax.f32 %v520_v5, 0.0 }
  0xb0   : > { %622 = vmatpush1.msra.mxu0 %v540_v6  ;;  %711 = vmatpush1.msra.mxu1 %v542_v7  ;;  %v538_v12 = vmax.f32 %v522_v8, 0.0  ;;  %v573_v33 = vpop.permute.xlu1 %572  ;;  %v787_v7 = vld [vmem:[%s1696_s5] sm:$0xff]  ;;  %v788_v8 = vld [vmem:[%s1696_s5 + $0x8] sm:$0xff] }
  0xb1   : > { %623 = vmatprep.subr.mxu0 %v537_v9  ;;  %712 = vmatprep.subr.mxu1 %v539_v10  ;;  %v789_v9 = vld [vmem:[%s1696_s5 + $0x10] sm:$0xff]  ;;  %v790_v10 = vld [vmem:[%s1696_s5 + $0x18] sm:$0xff] }
  0xb2   : > { %624 = vmatpush1.msra.mxu0 %v536_v11  ;;  %713 = vmatpush1.msra.mxu1 %v538_v12 }
  0xb3   : > { %1277 = vmatmul.mubr.msk.f32.vlgmr.msra.gmra.mxu0 %vm580_vm0, %v552_v13  ;;  %1281 = vmatmul.mubr.msk.f32.vlgmr.msra.gmra.mxu1 %vm580_vm0, %v552_v13 }
  0xb4   : > { %663 = vmatprep.mubr.f32.mxu0 %v1415_v15  ;;  %752 = vmatprep.mubr.f32.mxu1 %v1415_v15  ;;  %v563_v58 = vpop.permute.xlu1 %562 }
  0xb7   : > { %1278 = vmatmul.mubr.msk.f32.gmra.mxu0 %vm580_vm0, %v553_v14  ;;  %1282 = vmatmul.mubr.msk.f32.gmra.mxu1 %vm580_vm0, %v553_v14 }
  0xb8   : > { %669 = vmatprep.mubr.f32.mxu0 %v1415_v15  ;;  %758 = vmatprep.mubr.f32.mxu1 %v1415_v15 }
  0xbb   : > { %1279 = vmatmul.mubr.msk.f32.gmra.mxu0 %vm580_vm0, %v554_v16  ;;  %1283 = vmatmul.mubr.msk.f32.gmra.mxu1 %vm580_vm0, %v554_v16 }
  0xbc   : > { %675 = vmatprep.mubr.f32.mxu0 %v1415_v15  ;;  %764 = vmatprep.mubr.f32.mxu1 %v1415_v15 }
  0xbf   : > { %1280 = vmatmul.mubr.msk.f32.gmra.mxu0 %vm580_vm0, %v555_v17  ;;  %1284 = vmatmul.mubr.msk.f32.gmra.mxu1 %vm580_vm0, %v555_v17 }
  0xc0   : > { %891 = vmatprep.mubr.f32.mxu0 %v1415_v15  ;;  %980 = vmatprep.mubr.f32.mxu1 %v1415_v15 }
 0x173   : > { %v659_v18 = vpop.f32.mrf.mxu0  ;;  %v748_v19 = vpop.f32.mrf.mxu1 }
 0x174   : > { %v660_v45 = vadd.f32 %v659_v18, %v563_v58  ;;  %v749_v46 = vadd.f32 %v748_v19, %v563_v58 }
 0x175   : > { %v661_v20 = vpop.f32.mrf.mxu0  ;;  %v750_v22 = vpop.f32.mrf.mxu1 }
 0x176   : > { %v662_v61 = vadd.f32 %v661_v20, %v563_v58  ;;  %v751_v62 = vadd.f32 %v750_v22, %v563_v58  ;;  %v771_v5 = vmax.f32 %v660_v45, 0.0  ;;  %v773_v6 = vmax.f32 %v749_v46, 0.0 }
 0x177   : > { %v665_v23 = vpop.f32.mrf.mxu0  ;;  %v754_v24 = vpop.f32.mrf.mxu1 }
 0x178   : > { %v666_v47 = vadd.f32 %v665_v23, %v568_v52  ;;  %v755_v48 = vadd.f32 %v754_v24, %v568_v52  ;;  %v772_v3 = vmax.f32 %v662_v61, 0.0  ;;  %v774_v4 = vmax.f32 %v751_v62, 0.0  ;;  %v813_v23 = vpop.permute.xlu0 %812 }
 0x179   : > { %v667_v25 = vpop.f32.mrf.mxu0  ;;  %v756_v26 = vpop.f32.mrf.mxu1 }
 0x17a   : > { %v668_v30 = vadd.f32 %v667_v25, %v568_v52  ;;  %v757_v55 = vadd.f32 %v756_v26, %v568_v52  ;;  %v775_v2 = vmax.f32 %v666_v47, 0.0  ;;  %v777_v44 = vmax.f32 %v755_v48, 0.0  ;;  %v808_v26 = vpop.permute.xlu1 %807 }
 0x17b   : > { %v671_v27 = vpop.f32.mrf.mxu0  ;;  %v760_v28 = vpop.f32.mrf.mxu1 }
 0x17c   : > { %v672_v53 = vadd.f32 %v671_v27, %v573_v33  ;;  %v761_v54 = vadd.f32 %v760_v28, %v573_v33  ;;  %v776_v0 = vmax.f32 %v668_v30, 0.0  ;;  %v778_v1 = vmax.f32 %v757_v55, 0.0 }
 0x17d   : > { %v673_v31 = vpop.f32.mrf.mxu0  ;;  %v762_v32 = vpop.f32.mrf.mxu1 }
 0x17e   : > { %v674_v40 = vadd.f32 %v673_v31, %v573_v33  ;;  %v763_v41 = vadd.f32 %v762_v32, %v573_v33  ;;  %v779_v49 = vmax.f32 %v672_v53, 0.0  ;;  %v781_v63 = vmax.f32 %v761_v54, 0.0  ;;  %v798_v52 = vpop.permute.xlu1 %797 }
 0x17f   : > { %v677_v34 = vpop.f32.mrf.mxu0  ;;  %v766_v35 = vpop.f32.mrf.mxu1 }
 0x180   : > { %v678_v36 = vadd.f32 %v677_v34, %v578_v29  ;;  %v767_v37 = vadd.f32 %v766_v35, %v578_v29  ;;  %v780_v50 = vmax.f32 %v674_v40, 0.0  ;;  %v782_v43 = vmax.f32 %v763_v41, 0.0 }
 0x181   : > { %v679_v38 = vpop.f32.mrf.mxu0  ;;  %v768_v39 = vpop.f32.mrf.mxu1 }
 0x182   : > { %v680_v42 = vadd.f32 %v679_v38, %v578_v29  ;;  %v769_v51 = vadd.f32 %v768_v39, %v578_v29  ;;  %v783_v59 = vmax.f32 %v678_v36, 0.0  ;;  %v785_v60 = vmax.f32 %v767_v37, 0.0  ;;  %v803_v37 = vpop.permute.xlu0 %802 }
 0x184   : > { %v784_v56 = vmax.f32 %v680_v42, 0.0  ;;  %v786_v57 = vmax.f32 %v769_v51, 0.0 }
 0x186   : > { %851 = vmatprep.subr.mxu0 %v784_v56  ;;  %940 = vmatprep.subr.mxu1 %v786_v57 }
 0x187   : > { %852 = vmatpush1.msra.mxu0 %v783_v59  ;;  %941 = vmatpush1.msra.mxu1 %v785_v60 }
 0x188   : > { %853 = vmatprep.subr.mxu0 %v780_v50  ;;  %942 = vmatprep.subr.mxu1 %v782_v43 }
 0x189   : > { %854 = vmatpush1.msra.mxu0 %v779_v49  ;;  %943 = vmatpush1.msra.mxu1 %v781_v63 }
 0x18a   : > { %855 = vmatprep.subr.mxu0 %v776_v0  ;;  %944 = vmatprep.subr.mxu1 %v778_v1  ;;  %v1021_v1 = vld [vmem:[%s1698_s7] sm:$0x3] }
 0x18b   : > { %856 = vmatpush1.msra.mxu0 %v775_v2  ;;  %945 = vmatpush1.msra.mxu1 %v777_v44  ;;  %v1416_v2 = vmov 1983009808  }
 0x18c   : > { %857 = vmatprep.subr.mxu0 %v772_v3  ;;  %946 = vmatprep.subr.mxu1 %v774_v4  ;;  %v1180_v44 = vunpack.c.l.s4 %v1416_v2 }
 0x18d   : > { %858 = vmatpush1.msra.mxu0 %v771_v5  ;;  %947 = vmatpush1.msra.mxu1 %v773_v6  ;;  %v1026_v6 = vpop.permute.xlu0 %1025 }
 0x18e   : > { %1285 = vmatmul.mubr.msk.f32.vlgmr.msra.gmra.mxu0 %vm580_vm0, %v787_v7  ;;  %1289 = vmatmul.mubr.msk.f32.vlgmr.msra.gmra.mxu1 %vm580_vm0, %v787_v7  ;;  %v1181_v3 = vunpack.c.0.s8 %v1180_v44 }
 0x18f   : > { %897 = vmatprep.mubr.f32.mxu0 %v1415_v15  ;;  %986 = vmatprep.mubr.f32.mxu1 %v1415_v15 }
 0x192   : > { %1286 = vmatmul.mubr.msk.f32.gmra.mxu0 %vm580_vm0, %v788_v8  ;;  %1290 = vmatmul.mubr.msk.f32.gmra.mxu1 %vm580_vm0, %v788_v8  ;;  %v1184_v8 = vsub.s32 %v1181_v3, %v1570_v21 }
 0x193   : > { %903 = vmatprep.mubr.f32.mxu0 %v1415_v15  ;;  %992 = vmatprep.mubr.f32.mxu1 %v1415_v15 }
 0x196   : > { %1287 = vmatmul.mubr.msk.f32.gmra.mxu0 %vm580_vm0, %v789_v9  ;;  %1291 = vmatmul.mubr.msk.f32.gmra.mxu1 %vm580_vm0, %v789_v9 }
 0x197   : > { %909 = vmatprep.mubr.f32.mxu0 %v1415_v15  ;;  %998 = vmatprep.mubr.f32.mxu1 %v1415_v15 }
 0x19a   : > { %1288 = vmatmul.mubr.msk.f32.gmra.mxu0 %vm580_vm0, %v790_v10  ;;  %1292 = vmatmul.mubr.msk.f32.gmra.mxu1 %vm580_vm0, %v790_v10 }
 0x19b   : > { %1095 = vmatprep.mubr.f32.mxu0 %v1415_v15  ;;  %1166 = vmatprep.mubr.f32.mxu1 %v1415_v15 }
 0x24e   : > { %v893_v11 = vpop.f32.mrf.mxu0  ;;  %v982_v12 = vpop.f32.mrf.mxu1 }
 0x24f   : > { %v894_v48 = vadd.f32 %v893_v11, %v798_v52  ;;  %v983_v59 = vadd.f32 %v982_v12, %v798_v52 }
 0x250   : > { %v895_v13 = vpop.f32.mrf.mxu0  ;;  %v984_v14 = vpop.f32.mrf.mxu1 }
 0x251   : > { %v896_v56 = vadd.f32 %v895_v13, %v798_v52  ;;  %v985_v57 = vadd.f32 %v984_v14, %v798_v52  ;;  %v1005_v63 = vmax.f32 %v894_v48, 0.0  ;;  %v1007_v0 = vmax.f32 %v983_v59, 0.0 }
 0x252   : > { %v899_v16 = vpop.f32.mrf.mxu0  ;;  %v988_v17 = vpop.f32.mrf.mxu1 }
 0x253   : > { %v900_v53 = vadd.f32 %v899_v16, %v803_v37  ;;  %v989_v54 = vadd.f32 %v988_v17, %v803_v37  ;;  %v1006_v46 = vmax.f32 %v896_v56, 0.0  ;;  %v1008_v49 = vmax.f32 %v985_v57, 0.0 }
 0x254   : > { %v901_v18 = vpop.f32.mrf.mxu0  ;;  %v990_v19 = vpop.f32.mrf.mxu1 }
 0x255   : > { %v902_v40 = vadd.f32 %v901_v18, %v803_v37  ;;  %v991_v41 = vadd.f32 %v990_v19, %v803_v37  ;;  %v1009_v43 = vmax.f32 %v900_v53, 0.0  ;;  %v1011_v45 = vmax.f32 %v989_v54, 0.0 }
 0x256   : > { %v905_v20 = vpop.f32.mrf.mxu0  ;;  %v994_v22 = vpop.f32.mrf.mxu1 }
 0x257   : > { %v906_v38 = vadd.f32 %v905_v20, %v808_v26  ;;  %v995_v39 = vadd.f32 %v994_v22, %v808_v26  ;;  %v1010_v62 = vmax.f32 %v902_v40, 0.0  ;;  %v1012_v50 = vmax.f32 %v991_v41, 0.0 }
 0x258   : > { %v907_v24 = vpop.f32.mrf.mxu0  ;;  %v996_v25 = vpop.f32.mrf.mxu1 }
 0x259   : > { %v908_v33 = vadd.f32 %v907_v24, %v808_v26  ;;  %v997_v34 = vadd.f32 %v996_v25, %v808_v26  ;;  %v1013_v60 = vmax.f32 %v906_v38, 0.0  ;;  %v1015_v61 = vmax.f32 %v995_v39, 0.0 }
 0x25a   : > { %v911_v27 = vpop.f32.mrf.mxu0  ;;  %v1000_v28 = vpop.f32.mrf.mxu1 }
 0x25b   : > { %v912_v29 = vadd.f32 %v911_v27, %v813_v23  ;;  %v1001_v31 = vadd.f32 %v1000_v28, %v813_v23  ;;  %v1014_v58 = vmax.f32 %v908_v33, 0.0  ;;  %v1016_v47 = vmax.f32 %v997_v34, 0.0 }
 0x25c   : > { %v913_v32 = vpop.f32.mrf.mxu0  ;;  %v1002_v15 = vpop.f32.mrf.mxu1 }
 0x25d   : > { %v914_v35 = vadd.f32 %v913_v32, %v813_v23  ;;  %v1003_v36 = vadd.f32 %v1002_v15, %v813_v23  ;;  %v1017_v30 = vmax.f32 %v912_v29, 0.0  ;;  %v1019_v55 = vmax.f32 %v1001_v31, 0.0 }
 0x25f   : > { %v1018_v42 = vmax.f32 %v914_v35, 0.0  ;;  %v1020_v51 = vmax.f32 %v1003_v36, 0.0 }
 0x261   : > { %1055 = vmatprep.subr.mxu0 %v1018_v42  ;;  %1126 = vmatprep.subr.mxu1 %v1020_v51 }
 0x262   : > { %1056 = vmatpush1.msra.mxu0 %v1017_v30  ;;  %1127 = vmatpush1.msra.mxu1 %v1019_v55 }
 0x263   : > { %1057 = vmatprep.subr.mxu0 %v1014_v58  ;;  %1128 = vmatprep.subr.mxu1 %v1016_v47 }
 0x264   : > { %1058 = vmatpush1.msra.mxu0 %v1013_v60  ;;  %1129 = vmatpush1.msra.mxu1 %v1015_v61 }
 0x265   : > { %1059 = vmatprep.subr.mxu0 %v1010_v62  ;;  %1130 = vmatprep.subr.mxu1 %v1012_v50 }
 0x266   : > { %1060 = vmatpush1.msra.mxu0 %v1009_v43  ;;  %1131 = vmatpush1.msra.mxu1 %v1011_v45 }
 0x267   : > { %1061 = vmatprep.subr.mxu0 %v1006_v46  ;;  %1132 = vmatprep.subr.mxu1 %v1008_v49 }
 0x268   : > { %1062 = vmatpush1.msra.mxu0 %v1005_v63  ;;  %1133 = vmatpush1.msra.mxu1 %v1007_v0 }
 0x269   : > { %1293 = vmatmul.mubr.msk.f32.vlgmr.msra.gmra.mxu0 %vm580_vm0, %v1021_v1  ;;  %1294 = vmatmul.mubr.msk.f32.vlgmr.msra.gmra.mxu1 %vm580_vm0, %v1021_v1 }
 0x329   : > { %v1097_v4 = vpop.f32.mrf.mxu0  ;;  %v1168_v5 = vpop.f32.mrf.mxu1 }
 0x32a   : > { %v1098_v10 = vadd.f32 %v1097_v4, %v1026_v6  ;;  %v1169_v11 = vadd.f32 %v1168_v5, %v1026_v6 }
 0x32b   : > { %v1099_v7 = vpop.f32.mrf.mxu0  ;;  %v1170_v9 = vpop.f32.mrf.mxu1 }
 0x32c   : > { %v1100_v12 = vadd.f32 %v1099_v7, %v1026_v6  ;;  %v1171_v13 = vadd.f32 %v1170_v9, %v1026_v6 }
 0x32e   : > { %v1177_v14 = vcombine.low %v1098_v10, %v1100_v12  ;;  %v1178_v16 = vcombine.low %v1169_v11, %v1171_v13 }
 0x330   : > { %v1185_v17 = vrot.slane %v1177_v14, %v1184_v8  ;;  %v1192_v18 = vrot.slane %v1178_v16, %v1184_v8 }
 0x332   : > { %v1193_v19 = vcombine.low %v1185_v17, %v1192_v18 }
 0x334   : > { %1195 = vst [vmem:[%s326_s21] sm:$0xff] %v1193_v19 }
 0x335   : > { %1364 = shalt.err (!%p1361_p3)
}
 0x336   : > { %s1365_s16 = scalar_lea.hbm %s1209_s25, 128  ;;  %s1369_s21 = scalar_lea.hbm %s1700_s9, 512 }
 0x337   : > { %p1366_p4 = scmp.ne.s32.totalorder %s1209_s25, %s1365_s16  ;;  %p1370_p9 = scmp.lt.s32.totalorder %s1209_s25, %s1700_s9 }
 0x338   : > { %p1371_p10 = scmp.lt.s32.totalorder %s1369_s21, %s1365_s16 }
 0x339   : > { %p1367_p7 = pnand %p1366_p4, %p1506_p5 }
 0x33a   : > { %p1372_p11 = por %p1371_p10, %p1370_p9 }
 0x33b   : > { %p1368_p8 = pneg %p1367_p7 }
 0x33d   : > { %p1373_p12 = pnand %p1372_p11, %p1368_p8 }
 0x33f   : > { %1376 = shalt.err (!%p1373_p12)
}
 0x340   : > { %1301 = dma.vmem_to_hbm [thread:$0]  (%p1506_p5), %s1212_s22, 128, %s1209_s25, %s1197_s26  }
 0x341 PF: > { %p1307_p13 = scmp.ge.s32.totalorder %s1411_s12, 2  ;;  %s1223_s27 = sand.u32 1, %s1399_s30  }
 0x342   : > { %s1224_s28 = scalar_lea.sflag [#allocation3], %s1223_s27 }
 0x343   : > { %p1304_p0 = pnand %p1307_p13, %p1510_p6 }
 0x345   : > { %p1305_p1 = pneg %p1304_p0 }
 0x347   : > { %1394 = dma.done.wait (%p1305_p1), %s1224_s28, 128  }
 0x348   : > { %1396 = vsyncadd (%p1305_p1), %s1224_s28, 4294967168  ;;  %p19_p2 = scmp.ge.s32.totalorder %s1493_s15, 6   ;;  %s1703_s30 = smov %s1403_s10 }
 0x349   : > { %s1704_s10 = smov %s1407_s11  ;;  %s1705_s11 = smov %s1504_s18 }
 0x34a   : > { %s1706_s12 = smov %s1493_s15  ;;  %21 = sbr.rel (!%p19_p2) target bundleno = 3 (0x3), region = 91 }
 0x34f   :  { %1229 = vsyncpa [#allocation3], 1 }
 0x350   :  { %1231 = vsyncpa [#allocation3 + $0x1], 1 }

</bundles_post_ra>
